<compile_context>
chip_gen: v7x
topology: tpu7x:2x2x1
jax: 0.10.0
libtpu: 0.0.40
codegen_flags: <defaults>
</compile_context>

<pallas_src>
import functools

import jax
import jax.numpy as jnp
from jax.experimental import pallas as pl
from jax.experimental.pallas import tpu as pltpu


def _round_up(x, m):
    return ((x + m - 1) // m) * m


def actor_kernel(x_ref, w1_ref, b1_ref, w2_ref, b2_ref, w3_ref, b3_ref, o_ref):
    # fc "input": (BT, S) @ (S, S) + (1, S), ReLU
    h = jnp.dot(x_ref[...], w1_ref[...], preferred_element_type=jnp.float32)
    h = jnp.maximum(h + b1_ref[...], 0.0)

    # fc1: (BT, S) @ (S, S) + (1, S), ReLU
    h = jnp.dot(h, w2_ref[...], preferred_element_type=jnp.float32)
    h = jnp.maximum(h + b2_ref[...], 0.0)

    # fc2: (BT, S) @ (S, A) + (1, A), ReLU
    h = jnp.dot(h, w3_ref[...], preferred_element_type=jnp.float32)
    h = jnp.maximum(h + b3_ref[...], 0.0)

    # numerically-stable softmax over the action dim
    m = jnp.max(h, axis=-1, keepdims=True)
    e = jnp.exp(h - m)
    s = jnp.sum(e, axis=-1, keepdims=True)
    # approx=False keeps the 1e-5 tolerance; approx=True would trade accuracy
    # for a free EUP reciprocal.
    o_ref[...] = (e * pl.reciprocal(s, approx=False)).astype(o_ref.dtype)


def pack_actor_params(params):
    """One-time layout conversion: (out,in)->(in,out) weights, (out,)->(1,out) biases."""
    return (
        jnp.asarray(params["input_w"]).T, jnp.asarray(params["input_b"]).reshape(1, -1),
        jnp.asarray(params["fc1_w"]).T,   jnp.asarray(params["fc1_b"]).reshape(1, -1),
        jnp.asarray(params["fc2_w"]).T,   jnp.asarray(params["fc2_b"]).reshape(1, -1),
    )


@functools.partial(jax.jit, static_argnames=("block_b",))
def actor_forward(state, packed, *, block_b=128):
    """state: (B, state_dim) float32. packed: output of pack_actor_params()."""
    w1, b1, w2, b2, w3, b3 = packed
    B, S = state.shape
    A = w3.shape[1]

    # Batch tile: multiple of 8 sublanes; small batches use a single tile.
    bt = min(block_b, _round_up(B, 8))
    Bp = _round_up(B, bt)
    x = state if Bp == B else jnp.pad(state, ((0, Bp - B), (0, 0)))

    resident = lambda shape: pl.BlockSpec(shape, lambda i: (0, 0))

    out = pl.pallas_call(
        actor_kernel,
        out_shape=jax.ShapeDtypeStruct((Bp, A), jnp.float32),
        grid_spec=pltpu.PrefetchScalarGridSpec(
            num_scalar_prefetch=0,
            grid=(Bp // bt,),
            in_specs=[
                pl.BlockSpec((bt, S), lambda i: (i, 0)),  # activations: tiled over batch
                resident((S, S)), resident((1, S)),        # input layer (VMEM-resident)
                resident((S, S)), resident((1, S)),        # fc1
                resident((S, A)), resident((1, A)),        # fc2
            ],
            out_specs=pl.BlockSpec((bt, A), lambda i: (i, 0)),
        ),
        compiler_params=pltpu.CompilerParams(
            dimension_semantics=("parallel",),  # megacore sharding on v7x
        ),
    )(x, w1, b1, w2, b2, w3, b3)

    return out[:B] if Bp != B else out


def init_actor_params(key, state_dim, action_dim):
    """Deterministic init matching PyTorch Linear shapes: W (out, in), b (out,)."""
    ks = jax.random.split(key, 6)

    def lin(kw, kb, fan_in, fan_out):
        bound = 1.0 / jnp.sqrt(fan_in)
        w = jax.random.uniform(kw, (fan_out, fan_in), jnp.float32, -bound, bound)
        b = jax.random.uniform(kb, (fan_out,), jnp.float32, -bound, bound)
        return w, b

    iw, ib = lin(ks[0], ks[1], state_dim, state_dim)
    f1w, f1b = lin(ks[2], ks[3], state_dim, state_dim)
    f2w, f2b = lin(ks[4], ks[5], state_dim, action_dim)
    return {
        "input_w": iw, "input_b": ib,
        "fc1_w": f1w, "fc1_b": f1b,
        "fc2_w": f2w, "fc2_b": f2b,
    }


def actor_ref(state, params):
    """Pure-JAX reference of the PyTorch forward pass."""
    h = state @ params["input_w"].T + params["input_b"]
    h = jnp.maximum(h, 0.0)
    h = h @ params["fc1_w"].T + params["fc1_b"]
    h = jnp.maximum(h, 0.0)
    h = h @ params["fc2_w"].T + params["fc2_b"]
    h = jnp.maximum(h, 0.0)  # ReLU before softmax: matches the given PyTorch Actor
    return jax.nn.softmax(h, axis=-1)


if __name__ == "__main__":
    state_dim, action_dim, batch = 32, 8, 2
    key = jax.random.PRNGKey(0)
    k_state, k_params, k_big = jax.random.split(key, 3)

    params = init_actor_params(k_params, state_dim, action_dim)
    packed = pack_actor_params(params)   # one-time layout conversion (hoisted)

    # Small batch (single tile).
    state = jax.random.normal(k_state, (batch, state_dim), dtype=jnp.float32)
    out = jax.block_until_ready(actor_forward(state, packed))
    ref = actor_ref(state, params)
    assert out.shape == (batch, action_dim)
    assert jnp.allclose(out, ref, atol=1e-5, rtol=1e-5), "mismatch vs reference (small batch)"
    assert jnp.allclose(jnp.sum(out, axis=-1), 1.0, atol=1e-5), "softmax rows must sum to 1"

    # Larger, non-tile-aligned batch to exercise the batch grid + padding path.
    big_b = 300
    state_big = jax.random.normal(k_big, (big_b, state_dim), dtype=jnp.float32)
    out_big = jax.block_until_ready(actor_forward(state_big, packed))
    ref_big = actor_ref(state_big, params)
    assert out_big.shape == (big_b, action_dim)
    assert jnp.allclose(out_big, ref_big, atol=1e-5, rtol=1e-5), "mismatch vs reference (big batch)"
    assert jnp.allclose(jnp.sum(out_big, axis=-1), 1.0, atol=1e-5), "softmax rows must sum to 1"

    print("KERNEL_OK")
</pallas_src>

<mosaic_0001>
module attributes {stable_mosaic.version = 11 : i64} {
  func.func @actor_kernel(%arg0: i32, %arg1: memref<8x32xf32, #tpu.memory_space<vmem>>, %arg2: memref<32x32xf32, #tpu.memory_space<vmem>>, %arg3: memref<1x32xf32, #tpu.memory_space<vmem>>, %arg4: memref<32x32xf32, #tpu.memory_space<vmem>>, %arg5: memref<1x32xf32, #tpu.memory_space<vmem>>, %arg6: memref<32x8xf32, #tpu.memory_space<vmem>>, %arg7: memref<1x8xf32, #tpu.memory_space<vmem>>, %arg8: memref<8x8xf32, #tpu.memory_space<vmem>>) attributes {dimension_semantics = [#tpu.dimension_semantics<parallel>], iteration_bounds = array<i64: 1>, scalar_prefetch = 0 : i64, scratch_operands = 0 : i64, tpu.core_type = #tpu.core_type<tc>, window_params = [{transform_indices = @transform_0, window_bounds = array<i64: 8, 32>}, {pipeline_mode = #tpu.pipeline_mode<synchronous>, transform_indices = @transform_1, window_bounds = array<i64: 32, 32>}, {pipeline_mode = #tpu.pipeline_mode<synchronous>, transform_indices = @transform_2, window_bounds = array<i64: 1, 32>}, {pipeline_mode = #tpu.pipeline_mode<synchronous>, transform_indices = @transform_3, window_bounds = array<i64: 32, 32>}, {pipeline_mode = #tpu.pipeline_mode<synchronous>, transform_indices = @transform_4, window_bounds = array<i64: 1, 32>}, {pipeline_mode = #tpu.pipeline_mode<synchronous>, transform_indices = @transform_5, window_bounds = array<i64: 32, 8>}, {pipeline_mode = #tpu.pipeline_mode<synchronous>, transform_indices = @transform_6, window_bounds = array<i64: 1, 8>}, {transform_indices = @transform_7, window_bounds = array<i64: 8, 8>}]} {
    %c0 = arith.constant 0 : index
    %c0_0 = arith.constant 0 : index
    %0 = vector.load %arg1[%c0, %c0_0] : memref<8x32xf32, #tpu.memory_space<vmem>>, vector<8x32xf32>
    %c0_1 = arith.constant 0 : index
    %c0_2 = arith.constant 0 : index
    %1 = vector.load %arg2[%c0_1, %c0_2] : memref<32x32xf32, #tpu.memory_space<vmem>>, vector<32x32xf32>
    %cst = arith.constant dense<0.000000e+00> : vector<8x32xf32>
    %2 = tpu.matmul %0, %1, %cst {dimension_numbers = #tpu.dot_dimension_numbers<[1], [0], [0], [1], [0, 0, 1, 1], [], []>} : vector<8x32xf32>, vector<32x32xf32>, vector<8x32xf32> -> vector<8x32xf32>
    %c0_3 = arith.constant 0 : index
    %c0_4 = arith.constant 0 : index
    %3 = vector.load %arg3[%c0_3, %c0_4] : memref<1x32xf32, #tpu.memory_space<vmem>>, vector<1x32xf32>
    %4 = vector.broadcast %3 : vector<1x32xf32> to vector<8x32xf32>
    %5 = arith.addf %2, %4 : vector<8x32xf32>
    %cst_5 = arith.constant 0.000000e+00 : f32
    %6 = vector.broadcast %cst_5 : f32 to vector<8x32xf32>
    %7 = arith.maximumf %5, %6 : vector<8x32xf32>
    %c0_6 = arith.constant 0 : index
    %c0_7 = arith.constant 0 : index
    %8 = vector.load %arg4[%c0_6, %c0_7] : memref<32x32xf32, #tpu.memory_space<vmem>>, vector<32x32xf32>
    %cst_8 = arith.constant dense<0.000000e+00> : vector<8x32xf32>
    %9 = tpu.matmul %7, %8, %cst_8 {dimension_numbers = #tpu.dot_dimension_numbers<[1], [0], [0], [1], [0, 0, 1, 1], [], []>} : vector<8x32xf32>, vector<32x32xf32>, vector<8x32xf32> -> vector<8x32xf32>
    %c0_9 = arith.constant 0 : index
    %c0_10 = arith.constant 0 : index
    %10 = vector.load %arg5[%c0_9, %c0_10] : memref<1x32xf32, #tpu.memory_space<vmem>>, vector<1x32xf32>
    %11 = vector.broadcast %10 : vector<1x32xf32> to vector<8x32xf32>
    %12 = arith.addf %9, %11 : vector<8x32xf32>
    %cst_11 = arith.constant 0.000000e+00 : f32
    %13 = vector.broadcast %cst_11 : f32 to vector<8x32xf32>
    %14 = arith.maximumf %12, %13 : vector<8x32xf32>
    %c0_12 = arith.constant 0 : index
    %c0_13 = arith.constant 0 : index
    %15 = vector.load %arg6[%c0_12, %c0_13] : memref<32x8xf32, #tpu.memory_space<vmem>>, vector<32x8xf32>
    %cst_14 = arith.constant dense<0.000000e+00> : vector<8x8xf32>
    %16 = tpu.matmul %14, %15, %cst_14 {dimension_numbers = #tpu.dot_dimension_numbers<[1], [0], [0], [1], [0, 0, 1, 1], [], []>} : vector<8x32xf32>, vector<32x8xf32>, vector<8x8xf32> -> vector<8x8xf32>
    %c0_15 = arith.constant 0 : index
    %c0_16 = arith.constant 0 : index
    %17 = vector.load %arg7[%c0_15, %c0_16] : memref<1x8xf32, #tpu.memory_space<vmem>>, vector<1x8xf32>
    %18 = vector.broadcast %17 : vector<1x8xf32> to vector<8x8xf32>
    %19 = arith.addf %16, %18 : vector<8x8xf32>
    %cst_17 = arith.constant 0.000000e+00 : f32
    %20 = vector.broadcast %cst_17 : f32 to vector<8x8xf32>
    %21 = arith.maximumf %19, %20 : vector<8x8xf32>
    %cst_18 = arith.constant dense<0xFF800000> : vector<8xf32>
    %22 = vector.multi_reduction <maximumf>, %21, %cst_18 [1] : vector<8x8xf32> to vector<8xf32>
    %23 = vector.shape_cast %22 : vector<8xf32> to vector<8x1xf32>
    %24 = vector.broadcast %23 : vector<8x1xf32> to vector<8x8xf32>
    %25 = arith.subf %21, %24 : vector<8x8xf32>
    %26 = math.exp %25 : vector<8x8xf32>
    %cst_19 = arith.constant dense<0.000000e+00> : vector<8xf32>
    %27 = vector.multi_reduction <add>, %26, %cst_19 [1] : vector<8x8xf32> to vector<8xf32>
    %28 = vector.shape_cast %27 : vector<8xf32> to vector<8x1xf32>
    %29 = tpu.reciprocal %28 : vector<8x1xf32> -> vector<8x1xf32>
    %30 = vector.broadcast %29 : vector<8x1xf32> to vector<8x8xf32>
    %31 = arith.mulf %26, %30 : vector<8x8xf32>
    %c0_20 = arith.constant 0 : index
    %c0_21 = arith.constant 0 : index
    %32 = vector.load %arg8[%c0_20, %c0_21] : memref<8x8xf32, #tpu.memory_space<vmem>>, vector<8x8xf32>
    tpu.vector_store %arg8[%c0_20, %c0_21], %31 {strides = array<i32>} : memref<8x8xf32, #tpu.memory_space<vmem>>, vector<8x8xf32>,
    return
  }
  func.func @transform_0(%arg0: i32) -> (i32, i32) {
    %c0_i32 = arith.constant 0 : i32
    %c0_i32_0 = arith.constant 0 : i32
    return %arg0, %c0_i32 : i32, i32
  }
  func.func @transform_1(%arg0: i32) -> (i32, i32) {
    %c0_i32 = arith.constant 0 : i32
    %c0_i32_0 = arith.constant 0 : i32
    %c0_i32_1 = arith.constant 0 : i32
    return %c0_i32, %c0_i32_0 : i32, i32
  }
  func.func @transform_2(%arg0: i32) -> (i32, i32) {
    %c0_i32 = arith.constant 0 : i32
    %c0_i32_0 = arith.constant 0 : i32
    %c0_i32_1 = arith.constant 0 : i32
    return %c0_i32, %c0_i32_0 : i32, i32
  }
  func.func @transform_3(%arg0: i32) -> (i32, i32) {
    %c0_i32 = arith.constant 0 : i32
    %c0_i32_0 = arith.constant 0 : i32
    %c0_i32_1 = arith.constant 0 : i32
    return %c0_i32, %c0_i32_0 : i32, i32
  }
  func.func @transform_4(%arg0: i32) -> (i32, i32) {
    %c0_i32 = arith.constant 0 : i32
    %c0_i32_0 = arith.constant 0 : i32
    %c0_i32_1 = arith.constant 0 : i32
    return %c0_i32, %c0_i32_0 : i32, i32
  }
  func.func @transform_5(%arg0: i32) -> (i32, i32) {
    %c0_i32 = arith.constant 0 : i32
    %c0_i32_0 = arith.constant 0 : i32
    %c0_i32_1 = arith.constant 0 : i32
    return %c0_i32, %c0_i32_0 : i32, i32
  }
  func.func @transform_6(%arg0: i32) -> (i32, i32) {
    %c0_i32 = arith.constant 0 : i32
    %c0_i32_0 = arith.constant 0 : i32
    %c0_i32_1 = arith.constant 0 : i32
    return %c0_i32, %c0_i32_0 : i32, i32
  }
  func.func @transform_7(%arg0: i32) -> (i32, i32) {
    %c0_i32 = arith.constant 0 : i32
    %c0_i32_0 = arith.constant 0 : i32
    return %arg0, %c0_i32 : i32, i32
  }
}

</mosaic_0001>

<bundles_post_ra>
// kernel: actor_forward.1
= control target key start
LH: loop header
LB: loop body
LE: loop exit
PB: predicated region body
PF: predicated region fallthrough
CT: control target
= control target key end

     0   :  { %12 = vsyncpa [#allocation3], 0  ;;  %s421_s24 = smov [#allocation2]   ;;  %s524_s0 = inlined_call_operand.vmem [shape: f32[8,32], index: 0, kind: input, shape index: {}]   ;;  %s525_s1 = inlined_call_operand.vmem [shape: f32[32,32], index: 1, kind: input, shape index: {}]   ;;  %s526_s2 = inlined_call_operand.vmem [shape: f32[1,32], index: 2, kind: input, shape index: {}]   ;;  %s527_s3 = inlined_call_operand.hbm [shape: f32[32,32], index: 3, kind: input, shape index: {}]   ;;  %s528_s4 = inlined_call_operand.vmem [shape: f32[1,32], index: 4, kind: input, shape index: {}]   ;;  %s529_s5 = inlined_call_operand.vmem [shape: f32[32,8], index: 5, kind: input, shape index: {}]   ;;  %s530_s6 = inlined_call_operand.vmem [shape: f32[1,8], index: 6, kind: input, shape index: {}]   ;;  %s531_s7 = inlined_call_operand.vmem [shape: f32[8,8], index: 7, kind: output, shape index: {}]  }
   0x1   :  { %s24_s25 = sshll.u32 %s421_s24, 4  ;;  %s397_s28 = scalar_lea.hbm %s527_s3, 512  ;;  %s25_s25 = int_to_ptr.vmem [resolvable:$true] %s24_s25 }
   0x2   :  { %p398_p0 = scmp.ne.s32.totalorder %s527_s3, %s397_s28  ;;  %p401_p1 = scmp.lt.u32.totalorder %s397_s28, %s527_s3 }
   0x4   :  { %p403_p2 = pnand %p401_p1, %p398_p0 }
   0x6   :  { %406 = shalt.err (!%p403_p2)
}
   0x7   :  { %s407_s10 = scalar_lea.vmem %s25_s25, 512  ;;  %p412_p4 = scmp.lt.s32.totalorder %s25_s25, %s25_s25 }
   0x8   :  { %p408_p3 = scmp.ne.s32.totalorder %s25_s25, %s407_s10  ;;  %p413_p5 = scmp.lt.s32.totalorder %s407_s10, %s407_s10 }
   0xa   :  { %p414_p6 = por %p413_p5, %p412_p4 }
   0xc   :  { %p415_p7 = pnand %p414_p6, %p408_p3 }
   0xe   :  { %418 = shalt.err (!%p415_p7)
}
   0xf   :  { %s422_s11 = smov 128   ;;  %s423_s12 = smov 8  }
  0x10   :  { %30 = dma.hbm_to_vmem [thread:$0]  %s527_s3, 512, %s25_s25, [#allocation3], %s422_s11, %s422_s11, %s423_s12  }
  0x11   :  { %419 = dma.done.wait [#allocation3], 512  }
  0x12   :  { %420 = vsyncadd [#allocation3], 4294966784  ;;  %v424_v0 = vmov 0.0|0.0   ;;  %vm425_vm0 = vmmov 0   ;;  %v426_v1 = vmov 0.0   ;;  %v41_v2 = vld [vmem:[%s525_s1] sm:$0xff] }
  0x13   :  { %369 = vmatprep.subr.bf16.mxu0 %v424_v0  ;;  %344 = vmatprep.mubr.msk.f32.mxu0 %vm425_vm0, %v426_v1  ;;  %v42_v3 = vld [vmem:[%s525_s1 + $0x8] sm:$0xff]  ;;  %v43_v4 = vld [vmem:[%s525_s1 + $0x10] sm:$0xff]  ;;  %v44_v6 = vld [vmem:[%s525_s1 + $0x18] sm:$0xff]  ;;  %vm52_vm1 = vcmask 261120   ;;  %vm297_vm2 = vcmask 64512  }
  0x14   :  { %375 = vmatprep.subr.bf16.mxu1 %v424_v0  ;;  %355 = vmatprep.mubr.msk.f32.mxu1 %vm425_vm0, %v426_v1  ;;  %v370_v5 = vpack.c.bf16 %v42_v3, %v41_v2  ;;  %v127_v7 = vld [vmem:[#allocation2] sm:$0xff]  ;;  %v128_v8 = vld [vmem:[#allocation2 + $0x8] sm:$0xff]  ;;  %v373_v9 = vpack.c.bf16 %v44_v6, %v43_v4  ;;  %v40_v11 = vld [vmem:[%s524_s0] sm:$0xff] }
  0x15   :  { %v376_v10 = vpack.c.bf16 %v128_v8, %v127_v7  ;;  %v129_v12 = vld [vmem:[#allocation2 + $0x10] sm:$0xff]  ;;  %v130_v13 = vld [vmem:[#allocation2 + $0x18] sm:$0xff]  ;;  %v213_v16 = vld [vmem:[%s529_s5 + $0x8] sm:$0xff] }
  0x16   :  { %371 = vmatpush3.bf16.msra.mxu0 %v370_v5  ;;  %v379_v14 = vpack.c.bf16 %v130_v13, %v129_v12  ;;  %v212_v15 = vld [vmem:[%s529_s5] sm:$0xff]  ;;  %v214_v23 = vld [vmem:[%s529_s5 + $0x10] sm:$0xff]  ;;  %v215_v24 = vld [vmem:[%s529_s5 + $0x18] sm:$0xff] }
  0x17   :  { %372 = vmatprep.subr.bf16.mxu0 %v424_v0  ;;  %377 = vmatpush3.bf16.msra.mxu1 %v376_v10  ;;  %v382_v17 = vpack.c.bf16 %v213_v16, %v212_v15  ;;  %v315_v18 = vld [vmem:[%s526_s2] ss:$0 sm:$0xff]  ;;  %v385_v25 = vpack.c.bf16 %v215_v24, %v214_v23 }
  0x18   :  { %378 = vmatprep.subr.bf16.mxu1 %v424_v0  ;;  %v317_v26 = vld [vmem:[%s528_s4] ss:$0 sm:$0xff] }
  0x19   :  { %v319_v31 = vld [vmem:[%s530_s6] ss:$0 sm:$0xff] }
  0x1a   :  { %374 = vmatpush3.bf16.msra.mxu0 %v373_v9 }
  0x1b   :  { %381 = vmatprep.subr.bf16.mxu0 %v424_v0  ;;  %380 = vmatpush3.bf16.msra.mxu1 %v379_v14 }
  0x1d   :  { %345 = vmatmul.mubr.msk.f32.vlgmr.msra.gmra.mrb[0].mxu0 %vm52_vm1, %v40_v11 }
  0x1e   :  { %366 = vmatprep.mubr.msk.f32.mxu0 %vm425_vm0, %v426_v1  ;;  %383 = vmatpush3.bf16.msra.mxu0 %v382_v17 }
  0x1f   :  { %384 = vmatprep.subr.bf16.mxu0 %v424_v0 }
  0x22   :  { %386 = vmatpush3.bf16.msra.mxu0 %v385_v25 }
  0xf0   :  { %v122_v19 = vpop.f32.mrb[0].mxu0 }
  0xf1   :  { %v123_v20 = vadd.f32 %v315_v18, %v122_v19  ;;  %v346_v21 = vpop.f32.mrb[1].mxu0 }
  0xf3   :  { %v126_v22 = vmax.f32 %v123_v20, 0.0 }
  0xf5   :  { %356 = vmatmul.mubr.msk.f32.vlgmr.msra.gmra.mrb[0].mxu1 %vm52_vm1, %v126_v22 }
 0x1c8   :  { %v207_v27 = vpop.f32.mrb[0].mxu1 }
 0x1c9   :  { %v208_v28 = vadd.f32 %v317_v26, %v207_v27  ;;  %v357_v29 = vpop.f32.mrb[1].mxu1 }
 0x1cb   :  { %v211_v30 = vmax.f32 %v208_v28, 0.0 }
 0x1cd   :  { %367 = vmatmul.mubr.msk.f32.vlgmr.msra.gmra.mrb[2].mxu0 %vm52_vm1, %v211_v30 }
 0x2a0   :  { %v292_v32 = vpop.f32.mrb[2].mxu0 }
 0x2a1   :  { %v293_v33 = vadd.f32 %v319_v31, %v292_v32  ;;  %v368_v34 = vpop.f32.mrb[3].mxu0 }
 0x2a3   :  { %v296_v35 = vmax.f32 %v293_v33, 0.0 }
 0x2a5   :  { %v298_v36 = vsel %vm297_vm2, %v296_v35, -inf }
 0x2a6   :  { %299 = vmax.xlane.f32.xlu0 %v298_v36 }
 0x333   :  { %v300_v37 = vpop.xlane.xlu0 %299 }
 0x334   :  { %v301_v38 = vsub.f32 %v296_v35, %v300_v37 }
 0x336   :  { %v302_v39 = vmul.f32 1.442695, %v301_v38 }
 0x338   :  { %393 = vpow2.f32 %v302_v39 }
 0x342   :  { %v394_v40 = vpop.eup %393 }
 0x343   :  { %v304_v41 = vsel %vm297_vm2, %v394_v40, 0.0 }
 0x344   :  { %305 = vadd.xlane.f32.xlu0 %v304_v41 }
 0x3d1   :  { %v306_v42 = vpop.xlane.xlu0 %305 }
 0x3d2   :  { %395 = vrcp.f32 %v306_v42 }
 0x3dc   :  { %v396_v43 = vpop.eup %395 }
 0x3dd   :  { %v308_v44 = vmul.f32 %v396_v43, %v394_v40 }
 0x3df   :  { %309 = vst.msk [vmem:[%s531_s7] sm:$0xff] %vm297_vm2, %v308_v44 }
 0x3e0   :  { %314 = vsyncpa [#allocation3], 1 }

</bundles_post_ra>
